<compile_context>
chip_gen: v7x
topology: tpu7x:2x2x1
jax: 0.10.0
libtpu: 0.0.40
codegen_flags: <defaults>
</compile_context>

<pallas_src>
import jax
import jax.numpy as jnp
from jax.experimental import pallas as pl
from jax.experimental.pallas import tpu as pltpu


def _round_up(x, m):
    return (x + m - 1) // m * m


def embed_tile_kernel(ids_ref, thi_ref, tmid_ref, tlo_ref, o_ref):
    """Gather + add for one tile of T tokens via a two-hot MXU matmul.

    ids_ref           : (T, 2) int32 — col 0: word id, col 1: V + pos id (concat-table row).
    thi/tmid/tlo_ref  : (K, E) bf16 — exact 3-way split of the f32 [word ; pos] table,
                        VMEM-resident across the grid (constant index_map).
    o_ref             : (T, E) output tile.
    """
    ids = ids_ref[...]                                       # (T, 2) int32
    T = o_ref.shape[0]
    K = thi_ref.shape[0]

    # Two-hot row selector: one 1 in [0, V) (word) and one in [V, V+L) (position).
    # Zero-padded table rows beyond V+L contribute nothing.
    col = jax.lax.broadcasted_iota(jnp.int32, (T, K), 1)
    hit = (col == ids[:, 0:1]) | (col == ids[:, 1:2])
    onehot = jnp.where(hit, 1.0, 0.0).astype(jnp.bfloat16)   # 0/1 are exact in bf16

    # word_row + pos_row, reconstructed at f32 precision from the three bf16 chunks.
    acc = jnp.dot(onehot, thi_ref[...], preferred_element_type=jnp.float32)
    acc = acc + jnp.dot(onehot, tmid_ref[...], preferred_element_type=jnp.float32)
    acc = acc + jnp.dot(onehot, tlo_ref[...], preferred_element_type=jnp.float32)
    o_ref[...] = acc.astype(o_ref.dtype)


def embedding_forward(input_ids, pos_ids, word_table, pos_table, tile_tokens=512):
    """input_ids / pos_ids: (B, S) int -> (B, S, E) embeddings (word + positional)."""
    B, S = input_ids.shape
    V, E = word_table.shape
    L, E2 = pos_table.shape
    assert E2 == E
    N = B * S

    # Token-tile size: large tiles push the dense output writeback toward HBM roofline;
    # for small N, shrink so the "parallel" token axis still yields >= 2 grid tiles.
    T = min(tile_tokens, max(8, _round_up(pl.cdiv(N, 2), 8)))
    N_pad = _round_up(N, T)
    num_tiles = N_pad // T

    # Pack ids into one (N_pad, 2) int32 array: col 0 = word id, col 1 = V + pos id.
    # (Clipping keeps out-of-range ids defined; PyTorch nn.Embedding would error instead.)
    wid = jnp.clip(input_ids.reshape(-1).astype(jnp.int32), 0, V - 1)
    pid = jnp.clip(pos_ids.reshape(-1).astype(jnp.int32), 0, L - 1) + V
    ids = jnp.stack([wid, pid], axis=-1)
    ids = jnp.pad(ids, ((0, N_pad - N), (0, 0)))

    # Concatenate the two tables and zero-pad the contraction dim to a multiple of 128
    # (clean MXU tiling).  One-time parameter preprocessing (cached alongside weights).
    K = _round_up(V + L, 128)
    tbl = jnp.concatenate(
        [word_table.astype(jnp.float32), pos_table.astype(jnp.float32)], axis=0)
    tbl = jnp.pad(tbl, ((0, K - (V + L)), (0, 0)))

    # Exact 3-way bf16 split: t_hi + t_mid + t_lo == tbl to ~2^-24 relative.
    t_hi = tbl.astype(jnp.bfloat16)
    r1 = tbl - t_hi.astype(jnp.float32)
    t_mid = r1.astype(jnp.bfloat16)
    t_lo = (r1 - t_mid.astype(jnp.float32)).astype(jnp.bfloat16)

    out_dtype = word_table.dtype
    itemsize = jnp.dtype(out_dtype).itemsize
    cost = pl.CostEstimate(
        flops=int(2 * N_pad * E),                      # one gathered add per output element
        transcendentals=0,
        bytes_accessed=int(3 * K * E * 2               # resident bf16 tables (fetched once)
                           + N_pad * 2 * 4             # packed ids
                           + N_pad * E * itemsize),    # dense output writeback (dominant)
    )

    out = pl.pallas_call(
        embed_tile_kernel,
        out_shape=jax.ShapeDtypeStruct((N_pad, E), out_dtype),
        grid=(num_tiles,),
        in_specs=[
            # packed token/position ids: one tiny (T, 2) DMA per step
            pl.BlockSpec((T, 2), lambda i: (i, 0)),
            # full table chunks, VMEM-resident (constant block index -> fetched once)
            pl.BlockSpec((K, E), lambda i: (0, 0)),
            pl.BlockSpec((K, E), lambda i: (0, 0)),
            pl.BlockSpec((K, E), lambda i: (0, 0)),
        ],
        out_specs=pl.BlockSpec((T, E), lambda i: (i, 0)),
        compiler_params=pltpu.CompilerParams(
            dimension_semantics=("parallel",),         # token tiles independent -> megacore
            vmem_limit_bytes=32 * 1024 * 1024,         # safe on v5e/v6e/v7x, ample here
        ),
        cost_estimate=cost,
    )(ids, t_hi, t_mid, t_lo)

    return out[:N].reshape(B, S, E)


if __name__ == "__main__":
    vocab_size, max_len, embed_size = 32, 16, 128
    batch, seq = 2, 8

    key = jax.random.PRNGKey(0)
    k_w, k_p, k_ids = jax.random.split(key, 3)

    # nn.Embedding default init: N(0, 1)
    word_table = jax.random.normal(k_w, (vocab_size, embed_size), dtype=jnp.float32)
    pos_table = jax.random.normal(k_p, (max_len, embed_size), dtype=jnp.float32)

    input_ids = jax.random.randint(k_ids, (batch, seq), 0, vocab_size, dtype=jnp.int32)
    pos_ids = jnp.broadcast_to(jnp.arange(seq, dtype=jnp.int32), (batch, seq))

    out = embedding_forward(input_ids, pos_ids, word_table, pos_table)
    out = jax.block_until_ready(out)

    # reference check (plain JAX gather)
    ref = jnp.take(word_table, input_ids, axis=0) + jnp.take(pos_table, pos_ids, axis=0)
    assert out.shape == (batch, seq, embed_size)
    assert jnp.allclose(out, ref, atol=1e-5, rtol=1e-5), "mismatch vs reference"

    print("KERNEL_OK")
</pallas_src>

<mosaic_0001>
module attributes {stable_mosaic.version = 11 : i64} {
  func.func @embed_tile_kernel(%arg0: i32, %arg1: memref<8x2xi32, #tpu.memory_space<vmem>>, %arg2: memref<128x128xbf16, #tpu.memory_space<vmem>>, %arg3: memref<128x128xbf16, #tpu.memory_space<vmem>>, %arg4: memref<128x128xbf16, #tpu.memory_space<vmem>>, %arg5: memref<8x128xf32, #tpu.memory_space<vmem>>) attributes {dimension_semantics = [#tpu.dimension_semantics<parallel>], iteration_bounds = array<i64: 2>, scalar_prefetch = 0 : i64, scratch_operands = 0 : i64, tpu.core_type = #tpu.core_type<tc>, window_params = [{transform_indices = @transform_0, window_bounds = array<i64: 8, 2>}, {pipeline_mode = #tpu.pipeline_mode<synchronous>, transform_indices = @transform_1, window_bounds = array<i64: 128, 128>}, {pipeline_mode = #tpu.pipeline_mode<synchronous>, transform_indices = @transform_2, window_bounds = array<i64: 128, 128>}, {pipeline_mode = #tpu.pipeline_mode<synchronous>, transform_indices = @transform_3, window_bounds = array<i64: 128, 128>}, {transform_indices = @transform_4, window_bounds = array<i64: 8, 128>}]} {
    %c0 = arith.constant 0 : index
    %c0_0 = arith.constant 0 : index
    %0 = vector.load %arg1[%c0, %c0_0] : memref<8x2xi32, #tpu.memory_space<vmem>>, vector<8x2xi32>
    %1 = tpu.iota {dimensions = array<i32: 1>} : vector<8x128xi32>
    %2 = vector.extract_strided_slice %0 {offsets = [0, 0], sizes = [8, 1], strides = [1, 1]} : vector<8x2xi32> to vector<8x1xi32>
    %3 = vector.broadcast %2 : vector<8x1xi32> to vector<8x128xi32>
    %4 = arith.cmpi eq, %1, %3 : vector<8x128xi32>
    %5 = vector.extract_strided_slice %0 {offsets = [0, 1], sizes = [8, 1], strides = [1, 1]} : vector<8x2xi32> to vector<8x1xi32>
    %6 = vector.broadcast %5 : vector<8x1xi32> to vector<8x128xi32>
    %7 = arith.cmpi eq, %1, %6 : vector<8x128xi32>
    %8 = arith.ori %4, %7 : vector<8x128xi1>
    %cst = arith.constant 1.000000e+00 : f32
    %cst_1 = arith.constant 0.000000e+00 : f32
    %9 = vector.broadcast %cst : f32 to vector<8x128xf32>
    %10 = vector.broadcast %cst_1 : f32 to vector<8x128xf32>
    %11 = arith.select %8, %9, %10 : vector<8x128xi1>, vector<8x128xf32>
    %12 = arith.truncf %11 : vector<8x128xf32> to vector<8x128xbf16>
    %c0_2 = arith.constant 0 : index
    %c0_3 = arith.constant 0 : index
    %13 = vector.load %arg2[%c0_2, %c0_3] : memref<128x128xbf16, #tpu.memory_space<vmem>>, vector<128x128xbf16>
    %cst_4 = arith.constant dense<0.000000e+00> : vector<8x128xf32>
    %14 = tpu.matmul %12, %13, %cst_4 {dimension_numbers = #tpu.dot_dimension_numbers<[1], [0], [0], [1], [0, 0, 1, 1], [], []>} : vector<8x128xbf16>, vector<128x128xbf16>, vector<8x128xf32> -> vector<8x128xf32>
    %c0_5 = arith.constant 0 : index
    %c0_6 = arith.constant 0 : index
    %15 = vector.load %arg3[%c0_5, %c0_6] : memref<128x128xbf16, #tpu.memory_space<vmem>>, vector<128x128xbf16>
    %cst_7 = arith.constant dense<0.000000e+00> : vector<8x128xf32>
    %16 = tpu.matmul %12, %15, %cst_7 {dimension_numbers = #tpu.dot_dimension_numbers<[1], [0], [0], [1], [0, 0, 1, 1], [], []>} : vector<8x128xbf16>, vector<128x128xbf16>, vector<8x128xf32> -> vector<8x128xf32>
    %17 = arith.addf %14, %16 : vector<8x128xf32>
    %c0_8 = arith.constant 0 : index
    %c0_9 = arith.constant 0 : index
    %18 = vector.load %arg4[%c0_8, %c0_9] : memref<128x128xbf16, #tpu.memory_space<vmem>>, vector<128x128xbf16>
    %cst_10 = arith.constant dense<0.000000e+00> : vector<8x128xf32>
    %19 = tpu.matmul %12, %18, %cst_10 {dimension_numbers = #tpu.dot_dimension_numbers<[1], [0], [0], [1], [0, 0, 1, 1], [], []>} : vector<8x128xbf16>, vector<128x128xbf16>, vector<8x128xf32> -> vector<8x128xf32>
    %20 = arith.addf %17, %19 : vector<8x128xf32>
    %c0_11 = arith.constant 0 : index
    %c0_12 = arith.constant 0 : index
    %21 = vector.load %arg5[%c0_11, %c0_12] : memref<8x128xf32, #tpu.memory_space<vmem>>, vector<8x128xf32>
    tpu.vector_store %arg5[%c0_11, %c0_12], %20 {strides = array<i32>} : memref<8x128xf32, #tpu.memory_space<vmem>>, vector<8x128xf32>,
    return
  }
  func.func @transform_0(%arg0: i32) -> (i32, i32) {
    %c0_i32 = arith.constant 0 : i32
    %c0_i32_0 = arith.constant 0 : i32
    return %arg0, %c0_i32 : i32, i32
  }
  func.func @transform_1(%arg0: i32) -> (i32, i32) {
    %c0_i32 = arith.constant 0 : i32
    %c0_i32_0 = arith.constant 0 : i32
    %c0_i32_1 = arith.constant 0 : i32
    return %c0_i32, %c0_i32_0 : i32, i32
  }
  func.func @transform_2(%arg0: i32) -> (i32, i32) {
    %c0_i32 = arith.constant 0 : i32
    %c0_i32_0 = arith.constant 0 : i32
    %c0_i32_1 = arith.constant 0 : i32
    return %c0_i32, %c0_i32_0 : i32, i32
  }
  func.func @transform_3(%arg0: i32) -> (i32, i32) {
    %c0_i32 = arith.constant 0 : i32
    %c0_i32_0 = arith.constant 0 : i32
    %c0_i32_1 = arith.constant 0 : i32
    return %c0_i32, %c0_i32_0 : i32, i32
  }
  func.func @transform_4(%arg0: i32) -> (i32, i32) {
    %c0_i32 = arith.constant 0 : i32
    %c0_i32_0 = arith.constant 0 : i32
    return %arg0, %c0_i32 : i32, i32
  }
}

</mosaic_0001>

<bundles_post_ra>
// kernel: tpu_custom_call.1
= control target key start
LH: loop header
LB: loop body
LE: loop exit
PB: predicated region body
PF: predicated region fallthrough
CT: control target
= control target key end

     0   :  { %9 = vsyncpa [#allocation3], 0  ;;  %s1352_s0 = inlined_call_operand.vmem [shape: s32[16,2], index: 0, kind: input, shape index: {}]   ;;  %s1353_s1 = inlined_call_operand.hbm [shape: bf16[128,128], index: 1, kind: input, shape index: {}]   ;;  %s1354_s2 = inlined_call_operand.hbm [shape: bf16[128,128], index: 2, kind: input, shape index: {}]   ;;  %s1355_s3 = inlined_call_operand.hbm [shape: bf16[128,128], index: 3, kind: input, shape index: {}]   ;;  %s1356_s4 = inlined_call_operand.hbm [shape: f32[16,128], index: 4, kind: output, shape index: {}]  }
   0x1   :  { %10 = vsyncpa [#allocation6], 0 }
   0x2   :  { %11 = vsyncpa [#allocation4], 0 }
   0x3   :  { %13 = vsyncpa [#allocation4 + $0x1], 0  ;;  %s1103_s15 = smov 0   ;;  %s1105_s16 = smov 0  }
   0x4   :  { %s1107_s17 = smov 0   ;;  %s1109_s18 = smov 0  }
   0x5 LB: > { %s1124_s19 = sadd.s32 4294967295, %s1065_s18   ;;  %s670_s20 = sadd.s32 4294967294, %s1065_s18   ;;  %s1065_s18 = sphi %s1109_s18, %s1377_s18   ;;  %s1061_s17 = sphi %s1107_s17, %s1376_s17   ;;  %s1057_s16 = sphi %s1105_s16, %s1375_s16   ;;  %s1053_s15 = sphi %s1103_s15, %s1374_s15  }
   0x6   : > { %s1128_s21 = sadd.s32 1, %s1065_s18   ;;  %s115_s22 = sadd.s32 1, %s1061_s17 }
   0x7   : > { %s112_s23 = ssub.s32 %s1065_s18, %s1128_s21  ;;  %p125_p0 = scmp.ne.s32.totalorder %s1061_s17, %s1057_s16 }
   0x8   : > { %p113_p1 = scmp.eq.s32.totalorder %s112_s23, 0  ;;  %p126_p2 = scmp.eq.s32.totalorder %s1124_s19, 1 }
   0x9   : > { %p131_p3 = scmp.ne.s32.totalorder %s1057_s16, %s1053_s15  ;;  %p132_p4 = scmp.eq.s32.totalorder %s670_s20, 1 }
   0xa   : > { %s1139_s24 = scalar_select %p113_p1, %s1061_s17, %s115_s22  }
   0xb   : > { %p1141_p5 = por %p126_p2, %p125_p0  ;;  %p1145_p6 = por %p132_p4, %p131_p3 }
   0xc   : > { %p671_p7 = scmp.ge.s32.totalorder %s1065_s18, 1  ;;  %p139_p8 = scmp.lt.s32.totalorder %s1065_s18, 3 }
   0xd   : > { %s1360_s25 = scalar_select %p1141_p5, 1, 0 }
   0xe   : > { %s1361_s26 = scalar_select %p1145_p6, 1, 0 }
   0xf   : > { %p1357_p9 = scmp.eq.s32.totalorder %s1124_s19, 0  ;;  %p1152_p10 = pnand %p671_p7, %p139_p8 }
  0x10   : > { %s1067_s28 = smov [#allocation5]   ;;  %s1068_s5 = smov [#allocation2]  }
  0x11   : > { %s1362_s27 = scalar_select %p1152_p10, 1, 0 }
  0x12   : > { %p822_p11 = pneg %p1152_p10  ;;  %s164_s29 = sshll.u32 %s1067_s28, 4  ;;  %s1158_s29 = int_to_ptr.vmem [resolvable:$true] %s164_s29 }
  0x13   : > { %s151_s6 = sshll.u32 %s1068_s5, 4  ;;  %s1069_s7 = smov [#allocation7]   ;;  %s1166_s6 = int_to_ptr.vmem [resolvable:$true] %s151_s6 }
  0x14   : > { %p1162_p12 = pnand %p1357_p9, %p822_p11  ;;  %s1168_s8 = sshll.u32 %s1069_s7, 4  ;;  %s178_s8 = int_to_ptr.vmem [resolvable:$true] %s1168_s8 }
  0x15   : > { %s911_s11 = scalar_lea.hbm %s1354_s2, 1024 }
  0x16   : > { %p912_p13 = scmp.ne.s32.totalorder %s1354_s2, %s911_s11  ;;  %p1178_p0 = pneg %p1162_p12 }
  0x17   : > { %p918_p3 = scmp.lt.u32.totalorder %s911_s11, %s1354_s2 }
  0x18   : > { %p914_p1 = pnand %p1178_p0, %p912_p13 }
  0x1a   : > { %p915_p2 = pneg %p914_p1 }
  0x1c   : > { %p920_p4 = pnand %p918_p3, %p915_p2 }
  0x1e   : > { %923 = shalt.err (!%p920_p4)
}
  0x1f   : > { %s924_s23 = scalar_lea.vmem %s1158_s29, 1024  ;;  %p932_p9 = scmp.lt.s32.totalorder %s1158_s29, %s1158_s29 }
  0x20   : > { %p925_p7 = scmp.ne.s32.totalorder %s1158_s29, %s924_s23  ;;  %p933_p6 = scmp.lt.s32.totalorder %s924_s23, %s924_s23 }
  0x22   : > { %p927_p8 = pnand %p925_p7, %p1178_p0  ;;  %p934_p13 = por %p933_p6, %p932_p9 }
  0x24   : > { %p928_p11 = pneg %p927_p8 }
  0x26   : > { %p935_p1 = pnand %p934_p13, %p928_p11 }
  0x28   : > { %938 = shalt.err (!%p935_p1)
}
  0x29   : > { %s1070_s28 = smov 64   ;;  %s1071_s5 = smov 4  }
  0x2a   : > { %828 = dma.hbm_to_vmem [thread:$0]  (!%p1162_p12), %s1354_s2, 1024, %s1158_s29, [#allocation6], %s1070_s28, %s1070_s28, %s1071_s5  }
  0x2b   : > { %s939_s12 = scalar_lea.hbm %s1353_s1, 1024 }
  0x2c   : > { %p940_p6 = scmp.ne.s32.totalorder %s1353_s1, %s939_s12  ;;  %p946_p3 = scmp.lt.u32.totalorder %s939_s12, %s1353_s1 }
  0x2e   : > { %p942_p9 = pnand %p940_p6, %p1178_p0 }
  0x30   : > { %p943_p2 = pneg %p942_p9 }
  0x32   : > { %p948_p4 = pnand %p946_p3, %p943_p2 }
  0x34   : > { %951 = shalt.err (!%p948_p4)
}
  0x35   : > { %s952_s29 = scalar_lea.vmem %s1166_s6, 1024  ;;  %p960_p13 = scmp.lt.s32.totalorder %s1166_s6, %s1166_s6 }
  0x36   : > { %p953_p7 = scmp.ne.s32.totalorder %s1166_s6, %s952_s29  ;;  %p961_p1 = scmp.lt.s32.totalorder %s952_s29, %s952_s29 }
  0x38   : > { %p955_p8 = pnand %p953_p7, %p1178_p0  ;;  %p962_p6 = por %p961_p1, %p960_p13 }
  0x3a   : > { %p956_p11 = pneg %p955_p8 }
  0x3c   : > { %p963_p9 = pnand %p962_p6, %p956_p11 }
  0x3e   : > { %966 = shalt.err (!%p963_p9)
}
  0x3f   : > { %825 = dma.hbm_to_vmem [thread:$0]  (!%p1162_p12), %s1353_s1, 1024, %s1166_s6, [#allocation3], %s1070_s28, %s1070_s28, %s1071_s5  }
  0x40   : > { %s967_s12 = scalar_lea.hbm %s1355_s3, 1024 }
  0x41   : > { %p968_p2 = scmp.ne.s32.totalorder %s1355_s3, %s967_s12  ;;  %p974_p7 = scmp.lt.u32.totalorder %s967_s12, %s1355_s3 }
  0x43   : > { %p970_p3 = pnand %p968_p2, %p1178_p0 }
  0x45   : > { %p971_p4 = pneg %p970_p3 }
  0x47   : > { %p976_p8 = pnand %p974_p7, %p971_p4 }
  0x49   : > { %979 = shalt.err (!%p976_p8)
}
  0x4a   : > { %s980_s29 = scalar_lea.vmem %s178_s8, 1024  ;;  %p988_p6 = scmp.lt.s32.totalorder %s178_s8, %s178_s8 }
  0x4b   : > { %p981_p11 = scmp.ne.s32.totalorder %s178_s8, %s980_s29  ;;  %p989_p9 = scmp.lt.s32.totalorder %s980_s29, %s980_s29 }
  0x4d   : > { %p983_p13 = pnand %p981_p11, %p1178_p0  ;;  %p990_p5 = por %p989_p9, %p988_p6 }
  0x4f   : > { %p984_p1 = pneg %p983_p13 }
  0x51   : > { %p991_p10 = pnand %p990_p5, %p984_p1 }
  0x53   : > { %994 = shalt.err (!%p991_p10)
}
  0x54   : > { %831 = dma.hbm_to_vmem [thread:$0]  (!%p1162_p12), %s1355_s3, 1024, %s178_s8, [#allocation6], %s1070_s28, %s1070_s28, %s1071_s5  }
  0x55   : > { %p1365_p2 = scmp.ne.s32.totalorder %s1362_s27, 0 }
  0x56   : > { %p1366_p0 = scmp.eq.s32.totalorder (!%p1365_p2), %s1124_s19, 0 }
  0x57   : > { %200 = sbr.rel (%p1365_p2) target bundleno = 501 (0x1f5), region = 36 }
  0x5e   : > { %1040 = dma.done.wait (%p1366_p0), [#allocation3], 1024   ;;  %p1367_p3 = pmov %p1366_p0 }
  0x5f   : > { %p1368_p5 = pmov %p1366_p0 }
  0x60   : > { %1042 = vsyncadd (%p1367_p3), [#allocation3], 4294966272 }
  0x61   : > { %1044 = dma.done.wait (%p1368_p5), [#allocation6], 2048   ;;  %p1369_p10 = pmov %p1366_p0 }
  0x62   : > { %p233_p4 = scmp.lt.s32.totalorder %s1124_s19, 1  ;;  %v1072_v0 = vmov 0   ;;  %v1073_v1 = vmov 0.0   ;;  %v887_v3 = vld [vmem:[#allocation2] sm:$0xff]   ;;  %v889_v5 = vld [vmem:[#allocation2 + $0x8] sm:$0xff]   ;;  %v1074_v7 = vmov 1   ;;  %v239_v20 = vlaneseq }
  0x63   : > { %1046 = vsyncadd (%p1369_p10), [#allocation6], 4294965248  ;;  %885 = vset.pattern.permute.xlu0 %v1072_v0  ;;  %763 = vmatprep.subr.bf16.mxu0 %v1073_v1  ;;  %v888_v4 = vld [vmem:[#allocation5] sm:$0xff]   ;;  %v890_v6 = vld [vmem:[#allocation5 + $0x8] sm:$0xff]   ;;  %vm1075_vm0 = vmmov 0   ;;  %s230_s5 = sand.u32 1, %s1057_s16  }
  0x64   : > { %s234_s27 = scalar_select %p233_p4, %s1124_s19, 1  ;;  %743 = vmatprep.subr.bf16.mxu1 %v1073_v1  ;;  %764 = vmatpush3.bf16.msra.mxu0 %v887_v3  ;;  %v891_v8 = vld [vmem:[#allocation2 + $0x10] sm:$0xff]   ;;  %v893_v10 = vld [vmem:[#allocation2 + $0x18] sm:$0xff]   ;;  %v895_v12 = vld [vmem:[#allocation2 + $0x20] sm:$0xff]   ;;  %v240_v22 = vand.u32 127, %v239_v20 }
  0x65   : > { %744 = vmatpush3.bf16.msra.mxu1 %v888_v4  ;;  %765 = vmatprep.subr.bf16.mxu0 %v1073_v1  ;;  %v892_v9 = vld [vmem:[#allocation5 + $0x10] sm:$0xff]   ;;  %v894_v11 = vld [vmem:[#allocation5 + $0x18] sm:$0xff]   ;;  %v896_v13 = vld [vmem:[#allocation5 + $0x20] sm:$0xff]   ;;  %v1076_v26 = vmov 1.0|1.0   ;;  %s680_s9 = sshll.u32 %s230_s5, 3 }
  0x66   : > { %s681_s30 = sshll.u32 %s234_s27, 3  ;;  %745 = vmatprep.subr.bf16.mxu1 %v1073_v1  ;;  %759 = vmatprep.mubr.msk.bf16.mxu1 %vm1075_vm0, %v1073_v1  ;;  %v897_v14 = vld [vmem:[#allocation2 + $0x28] sm:$0xff]   ;;  %v899_v16 = vld [vmem:[#allocation2 + $0x30] sm:$0xff]   ;;  %v901_v18 = vld [vmem:[#allocation2 + $0x38] sm:$0xff]   ;;  %s713_s10 = sshll.u32 %s1124_s19, 7 }
  0x67   : > { %s236_s28 = scalar_lea.vmem %s1352_s0, %s681_s30  ;;  %779 = vmatprep.mubr.msk.bf16.mxu0 %vm1075_vm0, %v1073_v1  ;;  %v898_v15 = vld [vmem:[#allocation5 + $0x28] sm:$0xff]   ;;  %v900_v17 = vld [vmem:[#allocation5 + $0x30] sm:$0xff]   ;;  %v902_v19 = vld [vmem:[#allocation5 + $0x38] sm:$0xff]   ;;  %s232_s11 = scalar_lea.vmem [#allocation8], %s680_s9 }
  0x68   : > { %v238_v2 = vld [vmem:[%s236_s28] sm:$0xff]  ;;  %766 = vmatpush3.bf16.msra.mxu0 %v889_v5  ;;  %v903_v24 = vld [vmem:[#allocation7] sm:$0xff]   ;;  %v904_v27 = vld [vmem:[#allocation7 + $0x8] sm:$0xff]   ;;  %s580_s12 = sshll.u32 %s232_s11, 4  ;;  %s1310_s22 = scalar_lea.hbm %s1356_s4, %s713_s10  ;;  %s1312_s12 = int_to_ptr.vmem [resolvable:$true] %s580_s12 }
  0x69   : > { %242 = vperm.xlu0 %885, %v238_v2   ;;  %746 = vmatpush3.bf16.msra.mxu1 %v890_v6  ;;  %v905_v28 = vld [vmem:[#allocation7 + $0x10] sm:$0xff]   ;;  %v906_v29 = vld [vmem:[#allocation7 + $0x18] sm:$0xff]   ;;  %v907_v30 = vld [vmem:[#allocation7 + $0x20] sm:$0xff]   ;;  %s567_s23 = scalar_lea.sflag [#allocation4], %s230_s5  ;;  %s995_s19 = scalar_lea.vmem %s1312_s12, 128 }
  0x6a   : > { %767 = vmatprep.subr.bf16.mxu0 %v1073_v1  ;;  %747 = vmatprep.subr.bf16.mxu1 %v1073_v1  ;;  %v908_v31 = vld [vmem:[#allocation7 + $0x28] sm:$0xff]   ;;  %v909_v32 = vld [vmem:[#allocation7 + $0x30] sm:$0xff]   ;;  %v910_v33 = vld [vmem:[#allocation7 + $0x38] sm:$0xff]   ;;  %p996_p12 = scmp.ne.s32.totalorder %s1312_s12, %s995_s19  ;;  %p1372_p7 = scmp.ne.s32.totalorder %s1360_s25, 0 }
  0x6b   : > { %s1077_s29 = smov [#allocation8]  }
  0x6c   : > { %768 = vmatpush3.bf16.msra.mxu0 %v891_v8  ;;  %p997_p8 = pnand %p996_p12, %p1372_p7  ;;  %s999_s6 = sshll.u32 %s1077_s29, 4  ;;  %s1000_s6 = int_to_ptr.vmem [resolvable:$false] %s999_s6 }
  0x6d   : > { %886 = vset.pattern.permute.xlu0 %v1074_v7  ;;  %748 = vmatpush3.bf16.msra.mxu1 %v892_v9  ;;  %s1001_s7 = scalar_lea.vmem %s1000_s6, 256  ;;  %p1002_p13 = scmp.lt.s32.totalorder %s1312_s12, %s1000_s6 }
  0x6e   : > { %246 = vperm.xlu0 %886, %v238_v2   ;;  %769 = vmatprep.subr.bf16.mxu0 %v1073_v1  ;;  %p998_p11 = pneg %p997_p8  ;;  %p1003_p1 = scmp.lt.s32.totalorder %s1001_s7, %s995_s19 }
  0x6f   : > { %749 = vmatprep.subr.bf16.mxu1 %v1073_v1 }
  0x70   : > { %770 = vmatpush3.bf16.msra.mxu0 %v893_v10  ;;  %p1004_p6 = por %p1003_p1, %p1002_p13 }
  0x71   : > { %750 = vmatpush3.bf16.msra.mxu1 %v894_v11  ;;  %771 = vmatprep.subr.bf16.mxu0 %v1073_v1 }
  0x72   : > { %751 = vmatprep.subr.bf16.mxu1 %v1073_v1  ;;  %p1005_p9 = pnand %p1004_p6, %p998_p11 }
  0x74   : > { %772 = vmatpush3.bf16.msra.mxu0 %v895_v12 }
  0x75   : > { %752 = vmatpush3.bf16.msra.mxu1 %v896_v13  ;;  %773 = vmatprep.subr.bf16.mxu0 %v1073_v1 }
  0x76   : > { %753 = vmatprep.subr.bf16.mxu1 %v1073_v1 }
  0x78   : > { %774 = vmatpush3.bf16.msra.mxu0 %v897_v14 }
  0x79   : > { %754 = vmatpush3.bf16.msra.mxu1 %v898_v15  ;;  %775 = vmatprep.subr.bf16.mxu0 %v1073_v1 }
  0x7a   : > { %755 = vmatprep.subr.bf16.mxu1 %v1073_v1 }
  0x7c   : > { %776 = vmatpush3.bf16.msra.mxu0 %v899_v16 }
  0x7d   : > { %756 = vmatpush3.bf16.msra.mxu1 %v900_v17  ;;  %777 = vmatprep.subr.bf16.mxu0 %v1073_v1 }
  0x7e   : > { %757 = vmatprep.subr.bf16.mxu1 %v1073_v1 }
  0x80   : > { %778 = vmatpush3.bf16.msra.mxu0 %v901_v18 }
  0x81   : > { %758 = vmatpush3.bf16.msra.mxu1 %v902_v19  ;;  %783 = vmatprep.subr.bf16.mxu0 %v1073_v1 }
  0xe8   : > { %v243_v21 = vpop.permute.xlu0 %242 }
  0xe9   : > { %vm244_vm1 = vcmp.eq.s32.totalorder %v240_v22, %v243_v21 }
  0xed   : > { %v247_v23 = vpop.permute.xlu0 %246 }
  0xee   : > { %vm248_vm2 = vcmp.eq.s32.totalorder %v240_v22, %v247_v23 }
  0xef   : > { %vm249_vm3 = vmor %vm244_vm1, %vm248_vm2 }
  0xf0   : > { %vm1286_vm4 = vmpackc.low %vm249_vm3, %vm249_vm3 }
  0xf1   : > { %760 = vmatmul.mubr.msk.bf16.vlgmr.msra.gmra.mrb[0].mxu1 %vm1286_vm4, %v1076_v26  ;;  %780 = vmatmul.mubr.msk.bf16.vlgmr.msra.gmra.mrb[0].mxu0 %vm1286_vm4, %v1076_v26 }
  0xf2   : > { %784 = vmatpush3.bf16.msra.mxu0 %v903_v24  ;;  %799 = vmatprep.mubr.msk.bf16.mxu0 %vm1075_vm0, %v1073_v1 }
  0xf3   : > { %785 = vmatprep.subr.bf16.mxu0 %v1073_v1 }
  0xf6   : > { %786 = vmatpush3.bf16.msra.mxu0 %v904_v27 }
  0xf7   : > { %787 = vmatprep.subr.bf16.mxu0 %v1073_v1 }
  0xfa   : > { %788 = vmatpush3.bf16.msra.mxu0 %v905_v28 }
  0xfb   : > { %789 = vmatprep.subr.bf16.mxu0 %v1073_v1 }
  0xfe   : > { %790 = vmatpush3.bf16.msra.mxu0 %v906_v29 }
  0xff   : > { %791 = vmatprep.subr.bf16.mxu0 %v1073_v1 }
 0x102   : > { %792 = vmatpush3.bf16.msra.mxu0 %v907_v30 }
 0x103   : > { %793 = vmatprep.subr.bf16.mxu0 %v1073_v1 }
 0x106   : > { %794 = vmatpush3.bf16.msra.mxu0 %v908_v31 }
 0x107   : > { %795 = vmatprep.subr.bf16.mxu0 %v1073_v1 }
 0x10a   : > { %796 = vmatpush3.bf16.msra.mxu0 %v909_v32 }
 0x10b   : > { %797 = vmatprep.subr.bf16.mxu0 %v1073_v1 }
 0x10e   : > { %798 = vmatpush3.bf16.msra.mxu0 %v910_v33 }
 0x111   : > { %800 = vmatmul.mubr.msk.bf16.vlgmr.msra.gmra.mrb[0].mxu0 %vm1286_vm4, %v1076_v26 }
 0x1c4   : > { %v366_v34 = vpop.f32.mrb[0].mxu1 }
 0x1c5   : > { %v761_v35 = vpop.f32.mrb[1].mxu1 }
 0x1c6   : > { %v369_v36 = vpop.f32.mrb[2].mxu1 }
 0x1c7   : > { %v762_v37 = vpop.f32.mrb[3].mxu1 }
 0x1e4   : > { %v558_v38 = vpop.f32.mrb[0].mxu0 }
 0x1e5   : > { %v803_v39 = vadd.f32 %v558_v38, %v366_v34  ;;  %v801_v40 = vpop.f32.mrb[1].mxu0 }
 0x1e6   : > { %v561_v41 = vpop.f32.mrb[2].mxu0 }
 0x1e7   : > { %565 = vst [vmem:[%s232_s11] sm:$0xff] %v803_v39  ;;  %v802_v42 = vpop.f32.mrb[3].mxu0 }
 0x1e8   : > { %1008 = shalt.err (!%p1005_p9)
}
 0x1e9   : > { %s1009_s27 = scalar_lea.hbm %s1310_s22, 128  ;;  %s1013_s14 = scalar_lea.hbm %s1356_s4, 256 }
 0x1ea   : > { %p1010_p2 = scmp.ne.s32.totalorder %s1310_s22, %s1009_s27  ;;  %p1014_p5 = scmp.lt.u32.totalorder %s1310_s22, %s1356_s4 }
 0x1eb   : > { %p1015_p10 = scmp.lt.u32.totalorder %s1013_s14, %s1009_s27  ;;  %p1017_p12 = scmp.lt.u32.totalorder %s1009_s27, %s1310_s22 }
 0x1ec   : > { %p1011_p0 = pnand %p1010_p2, %p1372_p7 }
 0x1ed   : > { %p1016_p4 = por %p1015_p10, %p1014_p5 }
 0x1ee   : > { %p1012_p3 = pneg %p1011_p0 }
 0x1ef   : > { %p1018_p8 = por %p1017_p12, %p1016_p4 }
 0x1f1   : > { %p1019_p11 = pnand %p1018_p8, %p1012_p3 }
 0x1f3   : > { %1022 = shalt.err (!%p1019_p11)
}
 0x1f4   : > { %820 = dma.vmem_to_hbm [thread:$0]  (%p1372_p7), %s1312_s12, 128, %s1310_s22, %s567_s23  }
 0x1f5 PF: > { %p842_p13 = scmp.ge.s32.totalorder %s1065_s18, 2  ;;  %s592_s9 = sand.u32 1, %s1053_s15  }
 0x1f6   : > { %p1373_p1 = scmp.ne.s32.totalorder %s1361_s26, 0  ;;  %s593_s10 = scalar_lea.sflag [#allocation4], %s592_s9 }
 0x1f8   : > { %p833_p6 = pnand %p842_p13, %p1373_p1 }
 0x1fa   : > { %1048 = dma.done.wait (!%p833_p6), %s593_s10, 128  }
 0x1fb   : > { %1050 = vsyncadd (!%p833_p6), %s593_s10, 4294967168  ;;  %p16_p9 = scmp.ge.s32.totalorder %s1128_s21, 4   ;;  %s1374_s15 = smov %s1057_s16 }
 0x1fc   : > { %s1375_s16 = smov %s1061_s17  ;;  %s1376_s17 = smov %s1139_s24 }
 0x1fd   : > { %s1377_s18 = smov %s1128_s21  ;;  %18 = sbr.rel (!%p16_p9) target bundleno = 5 (0x5), region = 84 }
 0x204   :  { %598 = vsyncpa [#allocation3], 1 }
 0x205   :  { %600 = vsyncpa [#allocation3 + $0x1], 1 }
 0x206   :  { %601 = vsyncpa [#allocation6], 1 }
 0x207   :  { %602 = vsyncpa [#allocation4], 1 }
 0x208   :  { %604 = vsyncpa [#allocation4 + $0x1], 1 }

</bundles_post_ra>
